<compile_context>
chip_gen: v6e
topology: v6e:2x2x1
jax: 0.10.0
libtpu: 0.0.40
codegen_flags: <defaults>
</compile_context>

<pallas_src>
import jax
import jax.numpy as jnp
from jax.experimental import pallas as pl
from jax.experimental.pallas import tpu as pltpu

EPS = 1e-5  # nn.BatchNorm1d default


# --------------------------------------------------------------------------
# Kernels
# --------------------------------------------------------------------------
def _bn_relu_epilogue(h, gamma, beta):
    """h: (N, TN) f32 matmul result for the full batch of this feature tile."""
    inv_n = 1.0 / h.shape[0]
    # One-pass batch statistics (biased variance, training-mode BN).
    s = jnp.sum(h, axis=0, keepdims=True)                 # (1, TN)
    ss = jnp.sum(h * h, axis=0, keepdims=True)            # (1, TN)
    mean = s * inv_n
    # Clamp: one-pass E[h^2]-E[h]^2 can go slightly negative in f32.
    var = jnp.maximum(ss * inv_n - mean * mean, 0.0)
    inv = jax.lax.rsqrt(var + EPS)
    scale = gamma.astype(jnp.float32) * inv                # (1, TN)
    shift = beta.astype(jnp.float32) - mean * scale
    # Fused normalize + affine + ReLU in a single sweep of h.
    return jnp.maximum(h * scale + shift, 0.0)


def _kernel_inplace(x_ref, wt_ref, g_ref, b_ref, o_ref):
    """out_dtype == f32: accumulate directly into the resident output block."""
    k = pl.program_id(1)

    @pl.when(k == 0)
    def _init():
        o_ref[...] = jnp.zeros_like(o_ref)

    o_ref[...] += jnp.dot(
        x_ref[...], wt_ref[...], preferred_element_type=jnp.float32
    )

    @pl.when(k == pl.num_programs(1) - 1)
    def _finalize():
        o_ref[...] = _bn_relu_epilogue(o_ref[...], g_ref[...], b_ref[...])


def _kernel_scratch(x_ref, wt_ref, g_ref, b_ref, o_ref, acc_ref):
    """Generic out_dtype: f32 VMEM accumulator, cast on the final store."""
    k = pl.program_id(1)

    @pl.when(k == 0)
    def _init():
        acc_ref[...] = jnp.zeros_like(acc_ref)

    acc_ref[...] += jnp.dot(
        x_ref[...], wt_ref[...], preferred_element_type=jnp.float32
    )

    @pl.when(k == pl.num_programs(1) - 1)
    def _finalize():
        y = _bn_relu_epilogue(acc_ref[...], g_ref[...], b_ref[...])
        o_ref[...] = y.astype(o_ref.dtype)


# --------------------------------------------------------------------------
# Tile / VMEM budgeting helpers
# --------------------------------------------------------------------------
def _vmem_capacity_bytes():
    try:
        return int(pltpu.get_tpu_info().vmem_capacity_bytes)
    except Exception:
        return 64 * 1024 * 1024  # conservative fallback (v7x per-TC)


def _pick_divisor_tile(dim, target, align=128):
    """Largest multiple of `align` dividing `dim`, <= target; or full dim."""
    if dim <= target:
        return dim
    t = (min(target, dim) // align) * align
    while t >= align:
        if dim % t == 0:
            return t
        t -= align
    return dim  # no aligned divisor: fall back to the full (untiled) dim


def _footprint_bytes(n, tile_k, tile_n, x_bytes, w_bytes, out_bytes, use_scratch):
    f = 2 * n * tile_k * x_bytes          # x block, double-buffered
    f += 2 * tile_k * tile_n * w_bytes    # W^T block, double-buffered
    f += 2 * n * tile_n * out_bytes       # output block, double-buffered
    f += 2 * 2 * tile_n * 4               # gamma / beta blocks
    if use_scratch:
        f += n * tile_n * 4               # f32 accumulator scratch
    return f


# --------------------------------------------------------------------------
# Wrapper
# --------------------------------------------------------------------------
def linear_bn_relu(x, w, gamma, beta, *, tile_n=None, tile_k=None,
                   out_dtype=None, matmul_dtype=jnp.bfloat16):
    """x: (N, in_dim); w: (out_dim, in_dim); gamma/beta: (out_dim,).

    matmul_dtype: dtype the MXU operands are cast to (None = keep native).
    Accumulation is always f32; the BN/ReLU epilogue is always f32.
    """
    N, K = x.shape
    out_dim, K2 = w.shape
    assert K == K2
    out_dtype = jnp.dtype(out_dtype or x.dtype)

    # Optional operand cast (f32 accumulation retained regardless).
    x_mm = x if matmul_dtype is None else x.astype(matmul_dtype)
    # TODO(synk): cache the pre-transposed (and pre-cast) weight in module
    # state across calls instead of re-materializing it per invocation.
    wt = w.T
    if matmul_dtype is not None:
        wt = wt.astype(matmul_dtype)

    x_bytes = x_mm.dtype.itemsize
    w_bytes = wt.dtype.itemsize
    out_bytes = out_dtype.itemsize
    use_scratch = out_dtype != jnp.float32

    # ---- generation-aware VMEM budget -------------------------------------
    cap = _vmem_capacity_bytes()
    is_small_vmem = cap <= 64 * 1024 * 1024  # v7x-like (64 MiB per TC)
    # Leave headroom for Mosaic internal scratch and DMA queues.
    budget = int(min(0.80 * cap, (56 if is_small_vmem else 112) * 1024 * 1024))

    # ---- generation-aware default tiles ------------------------------------
    tile_n_target = tile_n if tile_n is not None else (256 if is_small_vmem else 512)
    tile_k_target = tile_k if tile_k is not None else (256 if is_small_vmem else 512)
    tile_n = _pick_divisor_tile(out_dim, tile_n_target)
    tile_k = _pick_divisor_tile(K, tile_k_target)

    # v7x has 2 TensorCores: keep >= 2 feature tiles on the parallel axis.
    if is_small_vmem and out_dim // tile_n < 2:
        smaller = _pick_divisor_tile(out_dim, max(tile_n // 2, 128))
        if out_dim // smaller >= 2:
            tile_n = smaller

    # Shrink K slab (then feature tile) until the footprint fits the budget.
    def _fits(tn, tk):
        return _footprint_bytes(N, tk, tn, x_bytes, w_bytes, out_bytes,
                                use_scratch) <= budget

    while (not _fits(tile_n, tile_k) and tile_k >= 256
           and (tile_k // 2) % 128 == 0 and K % (tile_k // 2) == 0):
        tile_k //= 2
    while (not _fits(tile_n, tile_k) and tile_n >= 256
           and (tile_n // 2) % 128 == 0 and out_dim % (tile_n // 2) == 0):
        tile_n //= 2
    if not _fits(tile_n, tile_k):
        # TODO(synk): two-pass BN (per-feature sum/sumsq, then normalize) for
        # batches too large to keep resident per feature tile.
        raise ValueError(
            f"batch N={N} too large for the fused batch-norm kernel within "
            f"{budget} bytes of VMEM (tiles n={tile_n}, k={tile_k}).")

    assert out_dim % tile_n == 0 and K % tile_k == 0

    gamma2 = gamma.reshape(1, out_dim)
    beta2 = beta.reshape(1, out_dim)

    grid = (out_dim // tile_n, K // tile_k)
    n_feature_tiles = grid[0]

    # x is re-read once per feature tile (index_map (0, k) for every j).
    cost = pl.CostEstimate(
        flops=2 * N * K * out_dim,
        transcendentals=0,
        bytes_accessed=(
            n_feature_tiles * N * K * x_bytes
            + K * out_dim * w_bytes
            + N * out_dim * out_bytes
            + 2 * out_dim * 4
        ),
    )

    kernel = _kernel_scratch if use_scratch else _kernel_inplace
    scratch_shapes = ([pltpu.VMEM((N, tile_n), jnp.float32)]
                      if use_scratch else [])

    return pl.pallas_call(
        kernel,
        out_shape=jax.ShapeDtypeStruct((N, out_dim), out_dtype),
        grid_spec=pltpu.PrefetchScalarGridSpec(
            num_scalar_prefetch=0,
            grid=grid,
            in_specs=[
                pl.BlockSpec((N, tile_k), lambda j, k: (0, k)),       # x K-slice
                pl.BlockSpec((tile_k, tile_n), lambda j, k: (k, j)),  # W^T tile
                pl.BlockSpec((1, tile_n), lambda j, k: (0, j)),       # gamma
                pl.BlockSpec((1, tile_n), lambda j, k: (0, j)),       # beta
            ],
            out_specs=pl.BlockSpec((N, tile_n), lambda j, k: (0, j)),
            scratch_shapes=scratch_shapes,
        ),
        compiler_params=pltpu.CompilerParams(
            dimension_semantics=("parallel", "arbitrary"),
            vmem_limit_bytes=budget,
        ),
        cost_estimate=cost,
    )(x_mm, wt, gamma2, beta2)


# --------------------------------------------------------------------------
# Reference & test
# --------------------------------------------------------------------------
def reference(x, w, gamma, beta):
    h = x.astype(jnp.float32) @ w.astype(jnp.float32).T
    mean = jnp.mean(h, axis=0, keepdims=True)
    var = jnp.mean((h - mean) ** 2, axis=0, keepdims=True)
    y = (h - mean) * jax.lax.rsqrt(var + EPS) * gamma[None, :] + beta[None, :]
    return jnp.maximum(y, 0.0)


if __name__ == "__main__":
    # Small shapes consistent with the module's forward: x is (batch, in_dim).
    N, in_dim, out_dim = 8, 32, 256

    key = jax.random.PRNGKey(0)
    kx, kw, kg, kb = jax.random.split(key, 4)

    x = jax.random.normal(kx, (N, in_dim), dtype=jnp.float32)

    # Deterministic parameter init (mimics nn.Linear's uniform(-1/sqrt(fan_in), +)).
    bound = 1.0 / (in_dim ** 0.5)
    w = jax.random.uniform(kw, (out_dim, in_dim), jnp.float32, -bound, bound)
    # BatchNorm affine params (affine=True); perturb defaults so the path is exercised.
    gamma = 1.0 + 0.1 * jax.random.uniform(kg, (out_dim,), jnp.float32, -1.0, 1.0)
    beta = 0.1 * jax.random.normal(kb, (out_dim,), jnp.float32)

    ref = reference(x, w, gamma, beta)

    # 1) Strict f32 matmul path (in-place accumulation into the output block).
    out_f32 = jax.block_until_ready(
        linear_bn_relu(x, w, gamma, beta, matmul_dtype=None))
    assert out_f32.shape == (N, out_dim)
    assert jnp.allclose(out_f32, ref, atol=1e-4, rtol=1e-4), \
        float(jnp.abs(out_f32 - ref).max())

    # 2) Default bf16-operand / f32-accumulate path (halves HBM traffic & VMEM).
    out_bf = jax.block_until_ready(linear_bn_relu(x, w, gamma, beta))
    assert jnp.allclose(out_bf, ref, atol=5e-2, rtol=5e-2), \
        float(jnp.abs(out_bf - ref).max())

    # 3) bf16 output path (exercises the scratch-accumulator kernel variant).
    out_bf16o = jax.block_until_ready(
        linear_bn_relu(x, w, gamma, beta, out_dtype=jnp.bfloat16))
    assert out_bf16o.dtype == jnp.bfloat16
    assert jnp.allclose(out_bf16o.astype(jnp.float32), ref, atol=8e-2, rtol=8e-2), \
        float(jnp.abs(out_bf16o.astype(jnp.float32) - ref).max())

    print("KERNEL_OK")
</pallas_src>

<mosaic_0001>
module attributes {stable_mosaic.version = 11 : i64} {
  func.func @_kernel_inplace(%arg0: i32, %arg1: i32, %arg2: memref<8x32xf32, #tpu.memory_space<vmem>>, %arg3: memref<32x128xf32, #tpu.memory_space<vmem>>, %arg4: memref<1x128xf32, #tpu.memory_space<vmem>>, %arg5: memref<1x128xf32, #tpu.memory_space<vmem>>, %arg6: memref<8x128xf32, #tpu.memory_space<vmem>>) attributes {dimension_semantics = [#tpu.dimension_semantics<parallel>, #tpu.dimension_semantics<arbitrary>], iteration_bounds = array<i64: 2, 1>, scalar_prefetch = 0 : i64, scratch_operands = 0 : i64, tpu.core_type = #tpu.core_type<tc>, window_params = [{transform_indices = @transform_0, window_bounds = array<i64: 8, 32>}, {transform_indices = @transform_1, window_bounds = array<i64: 32, 128>}, {transform_indices = @transform_2, window_bounds = array<i64: 1, 128>}, {transform_indices = @transform_3, window_bounds = array<i64: 1, 128>}, {transform_indices = @transform_4, window_bounds = array<i64: 8, 128>}]} {
    %c0_i32 = arith.constant 0 : i32
    %0 = arith.cmpi eq, %arg1, %c0_i32 : i32
    %1 = arith.extui %0 : i1 to i32
    %c0_i32_0 = arith.constant 0 : i32
    %2 = arith.cmpi ne, %1, %c0_i32_0 : i32
    scf.if %2 {
      %cst_10 = arith.constant 0.000000e+00 : f32
      %12 = vector.broadcast %cst_10 : f32 to vector<8x128xf32>
      %c0_11 = arith.constant 0 : index
      %c0_12 = arith.constant 0 : index
      %13 = vector.load %arg6[%c0_11, %c0_12] : memref<8x128xf32, #tpu.memory_space<vmem>>, vector<8x128xf32>
      tpu.vector_store %arg6[%c0_11, %c0_12], %12 {strides = array<i32>} : memref<8x128xf32, #tpu.memory_space<vmem>>, vector<8x128xf32>,
    } else {
    }
    %c0 = arith.constant 0 : index
    %c0_1 = arith.constant 0 : index
    %3 = vector.load %arg6[%c0, %c0_1] : memref<8x128xf32, #tpu.memory_space<vmem>>, vector<8x128xf32>
    %c0_2 = arith.constant 0 : index
    %c0_3 = arith.constant 0 : index
    %4 = vector.load %arg2[%c0_2, %c0_3] : memref<8x32xf32, #tpu.memory_space<vmem>>, vector<8x32xf32>
    %c0_4 = arith.constant 0 : index
    %c0_5 = arith.constant 0 : index
    %5 = vector.load %arg3[%c0_4, %c0_5] : memref<32x128xf32, #tpu.memory_space<vmem>>, vector<32x128xf32>
    %cst = arith.constant dense<0.000000e+00> : vector<8x128xf32>
    %6 = tpu.matmul %4, %5, %cst {dimension_numbers = #tpu.dot_dimension_numbers<[1], [0], [0], [1], [0, 0, 1, 1], [], []>} : vector<8x32xf32>, vector<32x128xf32>, vector<8x128xf32> -> vector<8x128xf32>
    %7 = arith.addf %3, %6 : vector<8x128xf32>
    %c0_6 = arith.constant 0 : index
    %c0_7 = arith.constant 0 : index
    %8 = vector.load %arg6[%c0_6, %c0_7] : memref<8x128xf32, #tpu.memory_space<vmem>>, vector<8x128xf32>
    tpu.vector_store %arg6[%c0_6, %c0_7], %7 {strides = array<i32>} : memref<8x128xf32, #tpu.memory_space<vmem>>, vector<8x128xf32>,
    %c0_i32_8 = arith.constant 0 : i32
    %9 = arith.cmpi eq, %arg1, %c0_i32_8 : i32
    %10 = arith.extui %9 : i1 to i32
    %c0_i32_9 = arith.constant 0 : i32
    %11 = arith.cmpi ne, %10, %c0_i32_9 : i32
    scf.if %11 {
      %c0_10 = arith.constant 0 : index
      %c0_11 = arith.constant 0 : index
      %12 = vector.load %arg6[%c0_10, %c0_11] : memref<8x128xf32, #tpu.memory_space<vmem>>, vector<8x128xf32>
      %c0_12 = arith.constant 0 : index
      %c0_13 = arith.constant 0 : index
      %13 = vector.load %arg4[%c0_12, %c0_13] : memref<1x128xf32, #tpu.memory_space<vmem>>, vector<1x128xf32>
      %c0_14 = arith.constant 0 : index
      %c0_15 = arith.constant 0 : index
      %14 = vector.load %arg5[%c0_14, %c0_15] : memref<1x128xf32, #tpu.memory_space<vmem>>, vector<1x128xf32>
      %cst_16 = arith.constant dense<0.000000e+00> : vector<128xf32>
      %15 = vector.multi_reduction <add>, %12, %cst_16 [0] : vector<8x128xf32> to vector<128xf32>
      %16 = vector.shape_cast %15 : vector<128xf32> to vector<1x128xf32>
      %17 = arith.mulf %12, %12 : vector<8x128xf32>
      %cst_17 = arith.constant dense<0.000000e+00> : vector<128xf32>
      %18 = vector.multi_reduction <add>, %17, %cst_17 [0] : vector<8x128xf32> to vector<128xf32>
      %19 = vector.shape_cast %18 : vector<128xf32> to vector<1x128xf32>
      %cst_18 = arith.constant 1.250000e-01 : f32
      %20 = vector.broadcast %cst_18 : f32 to vector<1x128xf32>
      %21 = arith.mulf %16, %20 : vector<1x128xf32>
      %cst_19 = arith.constant 1.250000e-01 : f32
      %22 = vector.broadcast %cst_19 : f32 to vector<1x128xf32>
      %23 = arith.mulf %19, %22 : vector<1x128xf32>
      %24 = arith.mulf %21, %21 : vector<1x128xf32>
      %25 = arith.subf %23, %24 : vector<1x128xf32>
      %cst_20 = arith.constant 0.000000e+00 : f32
      %26 = vector.broadcast %cst_20 : f32 to vector<1x128xf32>
      %27 = arith.maximumf %25, %26 : vector<1x128xf32>
      %cst_21 = arith.constant 9.99999974E-6 : f32
      %28 = vector.broadcast %cst_21 : f32 to vector<1x128xf32>
      %29 = arith.addf %27, %28 : vector<1x128xf32>
      %30 = math.rsqrt %29 : vector<1x128xf32>
      %31 = arith.mulf %13, %30 : vector<1x128xf32>
      %32 = arith.mulf %21, %31 : vector<1x128xf32>
      %33 = arith.subf %14, %32 : vector<1x128xf32>
      %34 = vector.broadcast %31 : vector<1x128xf32> to vector<8x128xf32>
      %35 = arith.mulf %12, %34 : vector<8x128xf32>
      %36 = vector.broadcast %33 : vector<1x128xf32> to vector<8x128xf32>
      %37 = arith.addf %35, %36 : vector<8x128xf32>
      %cst_22 = arith.constant 0.000000e+00 : f32
      %38 = vector.broadcast %cst_22 : f32 to vector<8x128xf32>
      %39 = arith.maximumf %37, %38 : vector<8x128xf32>
      %c0_23 = arith.constant 0 : index
      %c0_24 = arith.constant 0 : index
      %40 = vector.load %arg6[%c0_23, %c0_24] : memref<8x128xf32, #tpu.memory_space<vmem>>, vector<8x128xf32>
      tpu.vector_store %arg6[%c0_23, %c0_24], %39 {strides = array<i32>} : memref<8x128xf32, #tpu.memory_space<vmem>>, vector<8x128xf32>,
    } else {
    }
    return
  }
  func.func @transform_0(%arg0: i32, %arg1: i32) -> (i32, i32) {
    %c0_i32 = arith.constant 0 : i32
    %c0_i32_0 = arith.constant 0 : i32
    return %c0_i32, %arg1 : i32, i32
  }
  func.func @transform_1(%arg0: i32, %arg1: i32) -> (i32, i32) {
    %c0_i32 = arith.constant 0 : i32
    return %arg1, %arg0 : i32, i32
  }
  func.func @transform_2(%arg0: i32, %arg1: i32) -> (i32, i32) {
    %c0_i32 = arith.constant 0 : i32
    %c0_i32_0 = arith.constant 0 : i32
    return %c0_i32, %arg0 : i32, i32
  }
  func.func @transform_3(%arg0: i32, %arg1: i32) -> (i32, i32) {
    %c0_i32 = arith.constant 0 : i32
    %c0_i32_0 = arith.constant 0 : i32
    return %c0_i32, %arg0 : i32, i32
  }
  func.func @transform_4(%arg0: i32, %arg1: i32) -> (i32, i32) {
    %c0_i32 = arith.constant 0 : i32
    %c0_i32_0 = arith.constant 0 : i32
    return %c0_i32, %arg0 : i32, i32
  }
}

</mosaic_0001>

<bundles_post_ra>
// kernel: tpu_custom_call.1
= control target key start
LH: loop header
LB: loop body
LE: loop exit
PB: predicated region body
PF: predicated region fallthrough
CT: control target
= control target key end

     0   :  { %s996_s0 = inlined_call_operand.hbm [shape: f32[8,32], index: 0, kind: input, shape index: {}]   ;;  %s997_s1 = inlined_call_operand.hbm [shape: f32[32,256], index: 1, kind: input, shape index: {}]   ;;  %s998_s2 = inlined_call_operand.vmem [shape: f32[1,256], index: 2, kind: input, shape index: {}]   ;;  %s999_s3 = inlined_call_operand.vmem [shape: f32[1,256], index: 3, kind: input, shape index: {}]   ;;  %s1000_s4 = inlined_call_operand.hbm [shape: f32[8,256], index: 4, kind: output, shape index: {}]  }
   0x1   :  { %1004 = sst [smem:[#allocation12_spill]] %s996_s0 }
   0x2   :  { %9 = vsyncpa [#allocation3], 0 }
   0x3   :  { %10 = vsyncpa [#allocation6], 0 }
   0x4   :  { %12 = vsyncpa [#allocation6 + $0x1], 0 }
   0x5   :  { %13 = vsyncpa [#allocation4], 0 }
   0x6   :  { %15 = vsyncpa [#allocation4 + $0x1], 0  ;;  %s824_s15 = smov 0   ;;  %s826_s16 = smov 0  }
   0x7   :  { %s828_s17 = smov 0   ;;  %s830_s18 = smov 0  }
   0x8   :  { %s832_s19 = smov 0   ;;  %s834_s20 = smov 0  }
   0x9 LB: > { %s539_s21 = sadd.s32 4294967295, %s789_s20   ;;  %s540_s22 = sadd.s32 4294967294, %s789_s20   ;;  %s789_s20 = sphi %s834_s20, %s21_s20   ;;  %s785_s19 = sphi %s832_s19, %s1024_s19   ;;  %s781_s18 = sphi %s830_s18, %s1023_s18   ;;  %s777_s17 = sphi %s828_s17, %s1022_s17   ;;  %s773_s16 = sphi %s826_s16, %s1021_s16   ;;  %s769_s15 = sphi %s824_s15, %s1020_s15  }
   0xa   : > { %s68_s23 = sadd.s32 1, %s777_s17  ;;  %p75_p0 = scmp.ne.s32.totalorder %s777_s17, %s773_s16 }
   0xb   : > { %p76_p1 = scmp.eq.s32.totalorder %s789_s20, 0  ;;  %p81_p2 = scmp.ne.s32.totalorder %s773_s16, %s769_s15 }
   0xc   : > { %p862_p3 = scmp.eq.s32.totalorder %s539_s21, 0  ;;  %p157_p4 = scmp.eq.s32.totalorder %s539_s21, 1 }
   0xd   : > { %p866_p5 = por %p76_p1, %p75_p0  ;;  %p163_p6 = scmp.eq.s32.totalorder %s540_s22, 1 }
   0xe   : > { %p872_p7 = por %p862_p3, %p81_p2  ;;  %p876_p8 = por %p157_p4, %p75_p0 }
   0xf   : > { %p880_p9 = por %p163_p6, %p81_p2  ;;  %p541_p10 = scmp.ge.s32.totalorder %s789_s20, 1 }
  0x10   : > { %s1007_s26 = scalar_select %p872_p7, 1, 0 }
  0x11   : > { %s1008_s27 = scalar_select %p876_p8, 1, 0 }
  0x12   : > { %s1009_s28 = scalar_select %p880_p9, 1, 0 }
  0x13   : > { %p170_p11 = scmp.lt.s32.totalorder %s789_s20, 3  ;;  %s791_s30 = smov [#allocation2]  }
  0x14   : > { %s185_s5 = sshll.u32 %s791_s30, 4  ;;  %p592_p1 = scmp.lt.s32.totalorder %s789_s20, 2  ;;  %s186_s5 = int_to_ptr.vmem [resolvable:$true] %s185_s5 }
  0x15   : > { %p887_p13 = pnand %p541_p10, %p170_p11  ;;  %s33_s8 = sadd.s32 1, %s785_s19 }
  0x16   : > { %p896_p4 = pnand %p592_p1, %p866_p5  ;;  %p35_p6 = scmp.ge.s32.totalorder %s33_s8, 2 }
  0x17   : > { %p579_p0 = pneg %p887_p13  ;;  %s196_s9 = sand.u32 1, %s777_s17  }
  0x18   : > { %s662_s10 = scalar_lea.vmem %s186_s5, 128  ;;  %p670_p8 = scmp.lt.s32.totalorder %s186_s5, %s186_s5 }
  0x19   : > { %p902_p2 = pnand %p579_p0, %p862_p3  ;;  %p663_p11 = scmp.ne.s32.totalorder %s186_s5, %s662_s10 }
  0x1a   : > { %p671_p5 = scmp.lt.s32.totalorder %s662_s10, %s662_s10 }
  0x1b   : > { %p653_p10 = pneg %p902_p2 }
  0x1c   : > { %p672_p1 = por %p671_p5, %p670_p8 }
  0x1d   : > { %p665_p12 = pnand %p663_p11, %p653_p10 }
  0x1f   : > { %p666_p9 = pneg %p665_p12 }
  0x21   : > { %p673_p7 = pnand %p672_p1, %p666_p9 }
  0x23   : > { %676 = shalt.err (!%p673_p7)
}
  0x24   : > { %s1013_s0 = sld [smem:[#allocation12_spill]]  ;;  %s1026_s8 = smov (%p35_p6, %s33_s8), 0 }
  0x25   : > { %1014 = sst [smem:[#allocation11_spill]] %s1026_s8  ;;  %s544_s13 = sshll.u32 %s196_s9, 5 }
  0x26   : > { %s64_s14 = ssub.s32 %s785_s19, %s1026_s8  ;;  %s545_s21 = sshll.u32 %s785_s19, 7 }
  0x27   : > { %p66_p12 = scmp.eq.s32.totalorder %s64_s14, 0  ;;  %s208_s30 = scalar_lea.hbm %s997_s1, %s545_s21 }
  0x28   : > { %s200_s7 = scalar_lea.vmem [#allocation5], %s544_s13  ;;  %s197_s12 = scalar_lea.sflag [#allocation6], %s196_s9 }
  0x29   : > { %s209_s10 = sshll.u32 %s200_s7, 4  ;;  %p679_p7 = pneg %p896_p4  ;;  %s210_s10 = int_to_ptr.vmem [resolvable:$true] %s209_s10 }
  0x2a   : > { %582 = dma.hbm_to_vmem [thread:$0]  (!%p902_p2), %s1013_s0, 128, %s186_s5, [#allocation3]  }
  0x2b   : > { %s926_s11 = scalar_select %p66_p12, %s777_s17, %s68_s23  }
  0x2c   : > { %s690_s5 = scalar_lea.vmem %s210_s10, 512  ;;  %s792_s0 = smov [#allocation5]  }
  0x2d   : > { %p691_p8 = scmp.ne.s32.totalorder %s210_s10, %s690_s5  ;;  %s695_s14 = sshll.u32 %s792_s0, 4  ;;  %s696_s14 = int_to_ptr.vmem [resolvable:$false] %s695_s14 }
  0x2e   : > { %s697_s8 = scalar_lea.vmem %s696_s14, 1024  ;;  %p698_p2 = scmp.lt.s32.totalorder %s210_s10, %s696_s14 }
  0x2f   : > { %p693_p9 = pnand %p691_p8, %p679_p7  ;;  %p699_p6 = scmp.lt.s32.totalorder %s697_s8, %s690_s5 }
  0x31   : > { %p694_p0 = pneg %p693_p9  ;;  %p700_p10 = por %p699_p6, %p698_p2 }
  0x33   : > { %p701_p11 = pnand %p700_p10, %p694_p0 }
  0x35   : > { %704 = shalt.err (!%p701_p11)
}
  0x36   : > { %s793_s13 = smov 256   ;;  %s794_s23 = smov 128  }
  0x37   : > { %s795_s21 = smov 8   ;;  %233 = sbr.rel (%p887_p13) target bundleno = 328 (0x148), region = 36 }
  0x38   : > { %586 = dma.hbm_to_vmem [thread:$0]  (!%p896_p4), %s208_s30, 512, %s210_s10, %s197_s12, %s793_s13, %s794_s23, %s795_s21  }
  0x3c   : > { %756 = dma.done.wait (%p862_p3), [#allocation3], 128  }
  0x3d   : > { %758 = vsyncadd (%p862_p3), [#allocation3], 4294967168  ;;  %s939_s0 = sand.u32 1, %s773_s16   ;;  %p1015_p5 = scmp.ne.s32.totalorder %s1007_s26, 0 }
  0x3e   : > { %s548_s8 = sshll.u32 %s939_s0, 5  ;;  %s240_s9 = scalar_lea.sflag [#allocation6], %s939_s0 }
  0x3f   : > { %s243_s22 = scalar_lea.vmem [#allocation5], %s548_s8 }
  0x40   : > { %760 = dma.done.wait (%p1015_p5), %s240_s9, 512  }
  0x41   : > { %762 = vsyncadd (%p1015_p5), %s240_s9, 4294966784  ;;  %v796_v0 = vmov 0.0   ;;  %vm797_vm0 = vmmov 0   ;;  %v291_v1 = vld [vmem:[%s243_s22 + $0x18] sm:$0xff]  ;;  %v290_v2 = vld [vmem:[%s243_s22 + $0x10] sm:$0xff]  ;;  %vm292_vm1 = vcmask 261120   ;;  %v398_v27 = vlaneseq }
  0x42   : > { %560 = vmatprep.subr.mxu0 %v796_v0  ;;  %568 = vmatprep.mubr.msk.f32.mxu0 %vm797_vm0, %v796_v0  ;;  %v289_v3 = vld [vmem:[%s243_s22 + $0x8] sm:$0xff]  ;;  %v288_v4 = vld [vmem:[%s243_s22] sm:$0xff]  ;;  %v287_v5 = vld [vmem:[#allocation2] sm:$0xff]  ;;  %p275_p3 = scmp.lt.s32.totalorder %s781_s18, 1  ;;  %s549_s10 = sshll.u32 %s939_s0, 3 }
  0x43   : > { %561 = vmatpush3.msra.mxu0 %v291_v1  ;;  %v399_v28 = vshrl.u32 %v398_v27, 7  ;;  %s552_s12 = sshll.u32 %s781_s18, 7  ;;  %s273_s5 = scalar_lea.vmem [#allocation7], %s549_s10 }
  0x44   : > { %562 = vmatprep.subr.mxu0 %v796_v0  ;;  %s276_s24 = scalar_select %p275_p3, %s781_s18, 1 }
  0x45   : > { %563 = vmatpush3.msra.mxu0 %v290_v2  ;;  %v400_v30 = vsub.s32 0, %v399_v28  ;;  %s427_s14 = sshll.u32 %s273_s5, 4  ;;  %s425_s21 = scalar_lea.hbm %s1000_s4, %s552_s12  ;;  %s428_s14 = int_to_ptr.vmem [resolvable:$true] %s427_s14 }
  0x46   : > { %564 = vmatprep.subr.mxu0 %v796_v0  ;;  %s277_s6 = scalar_lea.vmem %s998_s2, %s276_s24  ;;  %s280_s7 = scalar_lea.vmem %s999_s3, %s276_s24 }
  0x47   : > { %565 = vmatpush3.msra.mxu0 %v289_v3  ;;  %v372_v29 = vld [vmem:[%s277_s6] sm:$0x1]  ;;  %s414_s8 = scalar_lea.sflag [#allocation4], %s939_s0  ;;  %s705_s9 = scalar_lea.vmem %s428_s14, 128 }
  0x48   : > { %566 = vmatprep.subr.mxu0 %v796_v0  ;;  %v373_v33 = vld [vmem:[%s280_s7] sm:$0x1]  ;;  %p706_p13 = scmp.ne.s32.totalorder %s428_s14, %s705_s9  ;;  %p1016_p4 = scmp.ne.s32.totalorder %s1008_s27, 0 }
  0x49   : > { %567 = vmatpush3.msra.mxu0 %v288_v4  ;;  %s798_s22 = smov [#allocation7]  }
  0x4a   : > { %569 = vmatmul.mubr.msk.f32.vlgmr.msra.gmra.mxu0 %vm292_vm1, %v287_v5  ;;  %p707_p1 = pnand %p706_p13, %p1016_p4  ;;  %s709_s24 = sshll.u32 %s798_s22, 4  ;;  %s710_s24 = int_to_ptr.vmem [resolvable:$false] %s709_s24 }
  0x4b   : > { %s711_s18 = scalar_lea.vmem %s710_s24, 256  ;;  %p712_p7 = scmp.lt.s32.totalorder %s428_s14, %s710_s24 }
  0x4c   : > { %p708_p12 = pneg %p707_p1  ;;  %p713_p8 = scmp.lt.s32.totalorder %s711_s18, %s705_s9 }
  0x4e   : > { %p714_p9 = por %p713_p8, %p712_p7 }
  0x50   : > { %p715_p0 = pnand %p714_p9, %p708_p12 }
 0x10a   : > { %v362_v6 = vpop.f32.mrf.mxu0 }
 0x10b   : > { %v374_v8 = vrot.slane %v362_v6, 4  ;;  %v380_v9 = vmul.f32 %v362_v6, %v362_v6 }
 0x10c   : > { %v570_v7 = vpop.f32.mrf.mxu0 }
 0x10d   : > { %v375_v10 = vadd.f32 %v374_v8, %v362_v6  ;;  %v381_v11 = vrot.slane %v380_v9, 4 }
 0x10f   : > { %v376_v12 = vrot.slane %v375_v10, 2  ;;  %v382_v13 = vadd.f32 %v381_v11, %v380_v9 }
 0x111   : > { %v377_v14 = vadd.f32 %v376_v12, %v375_v10  ;;  %v383_v15 = vrot.slane %v382_v13, 2 }
 0x113   : > { %v378_v16 = vrot.slane %v377_v14, 1  ;;  %v384_v17 = vadd.f32 %v383_v15, %v382_v13 }
 0x115   : > { %v379_v18 = vadd.f32 %v378_v16, %v377_v14  ;;  %v385_v19 = vrot.slane %v384_v17, 1 }
 0x117   : > { %v386_v20 = vadd.f32 %v385_v19, %v384_v17  ;;  %v387_v21 = vmul.f32 0.125, %v379_v18 }
 0x119   : > { %v388_v22 = vmul.f32 0.125, %v386_v20  ;;  %v389_v23 = vmul.f32 %v387_v21, %v387_v21 }
 0x11b   : > { %v390_v24 = vsub.f32 %v388_v22, %v389_v23 }
 0x11d   : > { %v391_v25 = vmax.f32 %v390_v24, 0.0 }
 0x11f   : > { %v392_v26 = vadd.f32 1e-05, %v391_v25 }
 0x121   : > { %649 = vrsqrt.f32 %v392_v26 }
 0x12e   : > { %v650_v31 = vpop.eup %649 }
 0x12f   : > { %v394_v32 = vmul.f32 %v650_v31, %v372_v29 }
 0x131   : > { %v395_v34 = vmul.f32 %v394_v32, %v387_v21  ;;  %v401_v35 = vrot.slane %v394_v32, %v400_v30 }
 0x133   : > { %v396_v36 = vsub.f32 %v373_v33, %v395_v34  ;;  %v403_v37 = vmul.f32 %v401_v35, %v362_v6 }
 0x135   : > { %v408_v38 = vrot.slane %v396_v36, %v400_v30 }
 0x137   : > { %v410_v39 = vadd.f32 %v408_v38, %v403_v37 }
 0x139   : > { %v411_v40 = vmax.f32 %v410_v39, 0.0 }
 0x13b   : > { %412 = vst [vmem:[%s273_s5] sm:$0xff] %v411_v40 }
 0x13c   : > { %718 = shalt.err (!%p715_p0)
}
 0x13d   : > { %s719_s26 = scalar_lea.hbm %s425_s21, 128  ;;  %s723_s6 = scalar_lea.hbm %s1000_s4, 256 }
 0x13e   : > { %p720_p2 = scmp.ne.s32.totalorder %s425_s21, %s719_s26  ;;  %p724_p11 = scmp.lt.s32.totalorder %s425_s21, %s1000_s4 }
 0x13f   : > { %p725_p5 = scmp.lt.s32.totalorder %s723_s6, %s719_s26 }
 0x140   : > { %p721_p6 = pnand %p720_p2, %p1016_p4 }
 0x141   : > { %p726_p3 = por %p725_p5, %p724_p11 }
 0x142   : > { %p722_p10 = pneg %p721_p6 }
 0x144   : > { %p727_p13 = pnand %p726_p3, %p722_p10 }
 0x146   : > { %730 = shalt.err (!%p727_p13)
}
 0x147   : > { %577 = dma.vmem_to_hbm [thread:$0]  (%p1016_p4), %s428_s14, 128, %s425_s21, %s414_s8  }
 0x148 PF: > { %s439_s7 = sand.u32 1, %s769_s15   ;;  %p1017_p1 = scmp.ne.s32.totalorder %s1009_s28, 0 }
 0x149   : > { %p1018_p12 = scmp.ge.s32.totalorder %s789_s20, 2  ;;  %s440_s10 = scalar_lea.sflag [#allocation4], %s439_s7 }
 0x14b   : > { %p588_p7 = pnand %p1018_p12, %p1017_p1 }
 0x14d   : > { %p589_p8 = pneg %p588_p7 }
 0x14f   : > { %764 = dma.done.wait (%p589_p8), %s440_s10, 128  }
 0x150   : > { %766 = vsyncadd (%p589_p8), %s440_s10, 4294967168  ;;  %s21_s20 = sadd.s32 1, %s789_s20   ;;  %s1019_s27 = sld [smem:[#allocation11_spill]] }
 0x151   : > { %p18_p9 = scmp.ge.s32.totalorder %s21_s20, 4   ;;  %s1020_s15 = smov %s773_s16 }
 0x152   : > { %s1021_s16 = smov %s777_s17  ;;  %s1022_s17 = smov %s926_s11 }
 0x153   : > { %s1023_s18 = smov %s785_s19  ;;  %20 = sbr.rel (!%p18_p9) target bundleno = 9 (0x9), region = 101 }
 0x156   : > { %s1024_s19 = smov %s1019_s27 }
 0x158   :  { %445 = vsyncpa [#allocation3], 1 }
 0x159   :  { %447 = vsyncpa [#allocation3 + $0x1], 1 }
 0x15a   :  { %448 = vsyncpa [#allocation6], 1 }
 0x15b   :  { %450 = vsyncpa [#allocation6 + $0x1], 1 }
 0x15c   :  { %451 = vsyncpa [#allocation4], 1 }
 0x15d   :  { %453 = vsyncpa [#allocation4 + $0x1], 1 }

</bundles_post_ra>
